<compile_context>
chip_gen: v7x
topology: tpu7x:2x2x1
jax: 0.10.0
libtpu: 0.0.40
codegen_flags: <defaults>
</compile_context>

<pallas_src>
import jax
import jax.numpy as jnp
from jax.experimental import pallas as pl
from jax.experimental.pallas import tpu as pltpu


def multi_label_ann_kernel(x_ref, wfc_ref, bfc_ref,
                           w1h_ref, w1x_ref, b1_ref,
                           w2_ref, b2_ref, o_ref):
    """Single fused step: fc layer -> fused head layer 1 -> block-diag head layer 2."""
    x = x_ref[...]

    # Full-connect stack: sigmoid(x @ W_fc + b_fc)
    h = jax.nn.sigmoid(
        jnp.dot(x, wfc_ref[...], preferred_element_type=jnp.float32) + bfc_ref[...]
    )

    # All heads' first layer at once, concat-free:
    #   z @ W1_all = h @ W1_all[:H_fc] + x @ W1_all[H_fc:]
    a1 = (jnp.dot(h, w1h_ref[...], preferred_element_type=jnp.float32)
          + jnp.dot(x, w1x_ref[...], preferred_element_type=jnp.float32)
          + b1_ref[...])
    h1 = jax.nn.sigmoid(a1)                                    # (bn, L*Hp)

    # All heads' second layer via block-diagonal weight -> lane-dense (bn, L*out_dim)
    y = jax.nn.sigmoid(
        jnp.dot(h1, w2_ref[...], preferred_element_type=jnp.float32) + b2_ref[...]
    )
    o_ref[...] = y


def _pick_block_n(n, max_block=512):
    """Largest batch tile <= max_block that divides N and is a multiple of 8 (or N)."""
    if n <= max_block:
        return n
    for bn in range(max_block, 7, -8):
        if n % bn == 0:
            return bn
    return n  # fall back to whole batch


def multi_label_ann_forward(x, params, num_labels):
    """x: (N, D_in) f32. params: dict of stacked weights. Returns (N, num_labels*out_dim)."""
    wfc, bfc = params["wfc"], params["bfc"]          # (D_in, H_fc), (1, H_fc)
    wp1, bp1 = params["wp1"], params["bp1"]          # (L, cat, Hp), (L, 1, Hp)
    wp2, bp2 = params["wp2"], params["bp2"]          # (L, Hp, out), (L, 1, out)

    N, D_in = x.shape
    H_fc = wfc.shape[1]
    L, cat_dim, Hp = wp1.shape
    out_dim = wp2.shape[2]
    assert L == num_labels and cat_dim == H_fc + D_in

    # Fuse per-label first-layer weights along the output axis: (cat, L*Hp),
    # column index = l*Hp + hp (label-major), then split the contraction dim so the
    # in-kernel concat([h, x]) is not needed.
    w1_all = jnp.transpose(wp1, (1, 0, 2)).reshape(cat_dim, L * Hp)
    w1_h = w1_all[:H_fc]                              # (H_fc, L*Hp)
    w1_x = w1_all[H_fc:]                              # (D_in, L*Hp)
    b1_all = bp1.reshape(1, L * Hp)                   # matches l*Hp + hp ordering

    # Block-diagonal second-layer weight -> output columns are exactly torch.cat(..., -1)
    # order: col = l*out_dim + o.
    w2_bd = jnp.einsum("lho,lm->lhmo", wp2, jnp.eye(L, dtype=wp2.dtype))
    w2_bd = w2_bd.reshape(L * Hp, L * out_dim)
    b2_all = bp2.reshape(1, L * out_dim)

    block_n = _pick_block_n(N)
    grid = (N // block_n,)

    out = pl.pallas_call(
        multi_label_ann_kernel,
        out_shape=jax.ShapeDtypeStruct((N, L * out_dim), jnp.float32),
        grid=grid,
        in_specs=[
            pl.BlockSpec((block_n, D_in), lambda i: (i, 0)),        # x (batch-tiled)
            pl.BlockSpec((D_in, H_fc), lambda i: (0, 0)),           # W_fc   (resident)
            pl.BlockSpec((1, H_fc), lambda i: (0, 0)),              # b_fc
            pl.BlockSpec((H_fc, L * Hp), lambda i: (0, 0)),         # W1 (h part)
            pl.BlockSpec((D_in, L * Hp), lambda i: (0, 0)),         # W1 (x part)
            pl.BlockSpec((1, L * Hp), lambda i: (0, 0)),            # b1 (all labels)
            pl.BlockSpec((L * Hp, L * out_dim), lambda i: (0, 0)),  # W2 block-diagonal
            pl.BlockSpec((1, L * out_dim), lambda i: (0, 0)),       # b2 (all labels)
        ],
        out_specs=pl.BlockSpec((block_n, L * out_dim), lambda i: (i, 0)),
        compiler_params=pltpu.CompilerParams(
            dimension_semantics=("parallel",),   # batch axis: shardable across TCs (v7x)
        ),
    )(x, wfc, bfc, w1_h, w1_x, b1_all, w2_bd, b2_all)

    return out


def _linear_init(key, fan_in, fan_out):
    """Deterministic init mimicking nn.Linear default (uniform ±1/sqrt(fan_in))."""
    kw, kb = jax.random.split(key)
    bound = 1.0 / jnp.sqrt(fan_in)
    w = jax.random.uniform(kw, (fan_in, fan_out), jnp.float32, -bound, bound)
    b = jax.random.uniform(kb, (fan_out,), jnp.float32, -bound, bound)
    return w, b


def make_params(key, d_in, h_fc, h_par, out_dim, num_labels):
    keys = jax.random.split(key, 1 + 2 * num_labels)
    wfc, bfc = _linear_init(keys[0], d_in, h_fc)
    cat_dim = h_fc + d_in
    wp1, bp1, wp2, bp2 = [], [], [], []
    for l in range(num_labels):
        w1, b1 = _linear_init(keys[1 + 2 * l], cat_dim, h_par)
        w2, b2 = _linear_init(keys[2 + 2 * l], h_par, out_dim)
        wp1.append(w1); bp1.append(b1[None, :])
        wp2.append(w2); bp2.append(b2[None, :])
    return {
        "wfc": wfc,
        "bfc": bfc[None, :],
        "wp1": jnp.stack(wp1),
        "bp1": jnp.stack(bp1),
        "wp2": jnp.stack(wp2),
        "bp2": jnp.stack(bp2),
    }


def reference_forward(x, params, num_labels):
    """Pure-JAX reference of MultiLabelAnn.forward (for verification only)."""
    h = jax.nn.sigmoid(x @ params["wfc"] + params["bfc"])
    z = jnp.concatenate([h, x], axis=1)
    outs = []
    for l in range(num_labels):
        h1 = jax.nn.sigmoid(z @ params["wp1"][l] + params["bp1"][l])
        h2 = jax.nn.sigmoid(h1 @ params["wp2"][l] + params["bp2"][l])
        outs.append(h2)
    return jnp.concatenate(outs, axis=-1)


if __name__ == "__main__":
    # Small shapes consistent with the module:
    #   para_full_connect_layer_num_nodes = [16, 32]   -> one Linear(16,32)+Sigmoid
    #   para_parallel_layer_num_nodes     = [48, 24, 2] (48 = 32 + 16 after concat)
    #   num_labels = 3, activators = 's'*100 (all Sigmoid)
    N, D_IN, H_FC, H_PAR, OUT_DIM, NUM_LABELS = 8, 16, 32, 24, 2, 3

    key = jax.random.PRNGKey(0)
    k_x, k_p = jax.random.split(key)
    x = jax.random.normal(k_x, (N, D_IN), jnp.float32)
    params = make_params(k_p, D_IN, H_FC, H_PAR, OUT_DIM, NUM_LABELS)

    y = multi_label_ann_forward(x, params, NUM_LABELS)
    y = jax.block_until_ready(y)

    y_ref = reference_forward(x, params, NUM_LABELS)
    assert y.shape == (N, NUM_LABELS * OUT_DIM)
    assert jnp.allclose(y, y_ref, atol=1e-5, rtol=1e-5), "mismatch vs pure-JAX reference"

    print("KERNEL_OK")
</pallas_src>

<mosaic_0001>
module attributes {stable_mosaic.version = 11 : i64} {
  func.func @multi_label_ann_kernel(%arg0: i32, %arg1: memref<8x16xf32, #tpu.memory_space<vmem>>, %arg2: memref<16x32xf32, #tpu.memory_space<vmem>>, %arg3: memref<1x32xf32, #tpu.memory_space<vmem>>, %arg4: memref<32x72xf32, #tpu.memory_space<vmem>>, %arg5: memref<16x72xf32, #tpu.memory_space<vmem>>, %arg6: memref<1x72xf32, #tpu.memory_space<vmem>>, %arg7: memref<72x6xf32, #tpu.memory_space<vmem>>, %arg8: memref<1x6xf32, #tpu.memory_space<vmem>>, %arg9: memref<8x6xf32, #tpu.memory_space<vmem>>) attributes {dimension_semantics = [#tpu.dimension_semantics<parallel>], iteration_bounds = array<i64: 1>, scalar_prefetch = 0 : i64, scratch_operands = 0 : i64, tpu.core_type = #tpu.core_type<tc>, window_params = [{transform_indices = @transform_0, window_bounds = array<i64: 8, 16>}, {pipeline_mode = #tpu.pipeline_mode<synchronous>, transform_indices = @transform_1, window_bounds = array<i64: 16, 32>}, {pipeline_mode = #tpu.pipeline_mode<synchronous>, transform_indices = @transform_2, window_bounds = array<i64: 1, 32>}, {pipeline_mode = #tpu.pipeline_mode<synchronous>, transform_indices = @transform_3, window_bounds = array<i64: 32, 72>}, {pipeline_mode = #tpu.pipeline_mode<synchronous>, transform_indices = @transform_4, window_bounds = array<i64: 16, 72>}, {pipeline_mode = #tpu.pipeline_mode<synchronous>, transform_indices = @transform_5, window_bounds = array<i64: 1, 72>}, {pipeline_mode = #tpu.pipeline_mode<synchronous>, transform_indices = @transform_6, window_bounds = array<i64: 72, 6>}, {pipeline_mode = #tpu.pipeline_mode<synchronous>, transform_indices = @transform_7, window_bounds = array<i64: 1, 6>}, {transform_indices = @transform_8, window_bounds = array<i64: 8, 6>}]} {
    %c0 = arith.constant 0 : index
    %c0_0 = arith.constant 0 : index
    %0 = vector.load %arg1[%c0, %c0_0] : memref<8x16xf32, #tpu.memory_space<vmem>>, vector<8x16xf32>
    %c0_1 = arith.constant 0 : index
    %c0_2 = arith.constant 0 : index
    %1 = vector.load %arg2[%c0_1, %c0_2] : memref<16x32xf32, #tpu.memory_space<vmem>>, vector<16x32xf32>
    %cst = arith.constant dense<0.000000e+00> : vector<8x32xf32>
    %2 = tpu.matmul %0, %1, %cst {dimension_numbers = #tpu.dot_dimension_numbers<[1], [0], [0], [1], [0, 0, 1, 1], [], []>} : vector<8x16xf32>, vector<16x32xf32>, vector<8x32xf32> -> vector<8x32xf32>
    %c0_3 = arith.constant 0 : index
    %c0_4 = arith.constant 0 : index
    %3 = vector.load %arg3[%c0_3, %c0_4] : memref<1x32xf32, #tpu.memory_space<vmem>>, vector<1x32xf32>
    %4 = vector.broadcast %3 : vector<1x32xf32> to vector<8x32xf32>
    %5 = arith.addf %2, %4 : vector<8x32xf32>
    %6 = arith.negf %5 : vector<8x32xf32>
    %7 = math.exp %6 : vector<8x32xf32>
    %cst_5 = arith.constant 1.000000e+00 : f32
    %8 = vector.broadcast %cst_5 : f32 to vector<8x32xf32>
    %9 = arith.addf %8, %7 : vector<8x32xf32>
    %10 = arith.divf %8, %9 : vector<8x32xf32>
    %c0_6 = arith.constant 0 : index
    %c0_7 = arith.constant 0 : index
    %11 = vector.load %arg4[%c0_6, %c0_7] : memref<32x72xf32, #tpu.memory_space<vmem>>, vector<32x72xf32>
    %cst_8 = arith.constant dense<0.000000e+00> : vector<8x72xf32>
    %12 = tpu.matmul %10, %11, %cst_8 {dimension_numbers = #tpu.dot_dimension_numbers<[1], [0], [0], [1], [0, 0, 1, 1], [], []>} : vector<8x32xf32>, vector<32x72xf32>, vector<8x72xf32> -> vector<8x72xf32>
    %c0_9 = arith.constant 0 : index
    %c0_10 = arith.constant 0 : index
    %13 = vector.load %arg5[%c0_9, %c0_10] : memref<16x72xf32, #tpu.memory_space<vmem>>, vector<16x72xf32>
    %cst_11 = arith.constant dense<0.000000e+00> : vector<8x72xf32>
    %14 = tpu.matmul %0, %13, %cst_11 {dimension_numbers = #tpu.dot_dimension_numbers<[1], [0], [0], [1], [0, 0, 1, 1], [], []>} : vector<8x16xf32>, vector<16x72xf32>, vector<8x72xf32> -> vector<8x72xf32>
    %15 = arith.addf %12, %14 : vector<8x72xf32>
    %c0_12 = arith.constant 0 : index
    %c0_13 = arith.constant 0 : index
    %16 = vector.load %arg6[%c0_12, %c0_13] : memref<1x72xf32, #tpu.memory_space<vmem>>, vector<1x72xf32>
    %17 = vector.broadcast %16 : vector<1x72xf32> to vector<8x72xf32>
    %18 = arith.addf %15, %17 : vector<8x72xf32>
    %19 = arith.negf %18 : vector<8x72xf32>
    %20 = math.exp %19 : vector<8x72xf32>
    %cst_14 = arith.constant 1.000000e+00 : f32
    %21 = vector.broadcast %cst_14 : f32 to vector<8x72xf32>
    %22 = arith.addf %21, %20 : vector<8x72xf32>
    %23 = arith.divf %21, %22 : vector<8x72xf32>
    %c0_15 = arith.constant 0 : index
    %c0_16 = arith.constant 0 : index
    %24 = vector.load %arg7[%c0_15, %c0_16] : memref<72x6xf32, #tpu.memory_space<vmem>>, vector<72x6xf32>
    %cst_17 = arith.constant dense<0.000000e+00> : vector<8x6xf32>
    %25 = tpu.matmul %23, %24, %cst_17 {dimension_numbers = #tpu.dot_dimension_numbers<[1], [0], [0], [1], [0, 0, 1, 1], [], []>} : vector<8x72xf32>, vector<72x6xf32>, vector<8x6xf32> -> vector<8x6xf32>
    %c0_18 = arith.constant 0 : index
    %c0_19 = arith.constant 0 : index
    %26 = vector.load %arg8[%c0_18, %c0_19] : memref<1x6xf32, #tpu.memory_space<vmem>>, vector<1x6xf32>
    %27 = vector.broadcast %26 : vector<1x6xf32> to vector<8x6xf32>
    %28 = arith.addf %25, %27 : vector<8x6xf32>
    %29 = arith.negf %28 : vector<8x6xf32>
    %30 = math.exp %29 : vector<8x6xf32>
    %cst_20 = arith.constant 1.000000e+00 : f32
    %31 = vector.broadcast %cst_20 : f32 to vector<8x6xf32>
    %32 = arith.addf %31, %30 : vector<8x6xf32>
    %33 = arith.divf %31, %32 : vector<8x6xf32>
    %c0_21 = arith.constant 0 : index
    %c0_22 = arith.constant 0 : index
    %34 = vector.load %arg9[%c0_21, %c0_22] : memref<8x6xf32, #tpu.memory_space<vmem>>, vector<8x6xf32>
    tpu.vector_store %arg9[%c0_21, %c0_22], %33 {strides = array<i32>} : memref<8x6xf32, #tpu.memory_space<vmem>>, vector<8x6xf32>,
    return
  }
  func.func @transform_0(%arg0: i32) -> (i32, i32) {
    %c0_i32 = arith.constant 0 : i32
    %c0_i32_0 = arith.constant 0 : i32
    return %arg0, %c0_i32 : i32, i32
  }
  func.func @transform_1(%arg0: i32) -> (i32, i32) {
    %c0_i32 = arith.constant 0 : i32
    %c0_i32_0 = arith.constant 0 : i32
    %c0_i32_1 = arith.constant 0 : i32
    return %c0_i32, %c0_i32_0 : i32, i32
  }
  func.func @transform_2(%arg0: i32) -> (i32, i32) {
    %c0_i32 = arith.constant 0 : i32
    %c0_i32_0 = arith.constant 0 : i32
    %c0_i32_1 = arith.constant 0 : i32
    return %c0_i32, %c0_i32_0 : i32, i32
  }
  func.func @transform_3(%arg0: i32) -> (i32, i32) {
    %c0_i32 = arith.constant 0 : i32
    %c0_i32_0 = arith.constant 0 : i32
    %c0_i32_1 = arith.constant 0 : i32
    return %c0_i32, %c0_i32_0 : i32, i32
  }
  func.func @transform_4(%arg0: i32) -> (i32, i32) {
    %c0_i32 = arith.constant 0 : i32
    %c0_i32_0 = arith.constant 0 : i32
    %c0_i32_1 = arith.constant 0 : i32
    return %c0_i32, %c0_i32_0 : i32, i32
  }
  func.func @transform_5(%arg0: i32) -> (i32, i32) {
    %c0_i32 = arith.constant 0 : i32
    %c0_i32_0 = arith.constant 0 : i32
    %c0_i32_1 = arith.constant 0 : i32
    return %c0_i32, %c0_i32_0 : i32, i32
  }
  func.func @transform_6(%arg0: i32) -> (i32, i32) {
    %c0_i32 = arith.constant 0 : i32
    %c0_i32_0 = arith.constant 0 : i32
    %c0_i32_1 = arith.constant 0 : i32
    return %c0_i32, %c0_i32_0 : i32, i32
  }
  func.func @transform_7(%arg0: i32) -> (i32, i32) {
    %c0_i32 = arith.constant 0 : i32
    %c0_i32_0 = arith.constant 0 : i32
    %c0_i32_1 = arith.constant 0 : i32
    return %c0_i32, %c0_i32_0 : i32, i32
  }
  func.func @transform_8(%arg0: i32) -> (i32, i32) {
    %c0_i32 = arith.constant 0 : i32
    %c0_i32_0 = arith.constant 0 : i32
    return %arg0, %c0_i32 : i32, i32
  }
}

</mosaic_0001>

<bundles_post_ra>
// kernel: tpu_custom_call.1
= control target key start
LH: loop header
LB: loop body
LE: loop exit
PB: predicated region body
PF: predicated region fallthrough
CT: control target
= control target key end

     0   :  { %v537_v2 = vmov 0.0|0.0   ;;  %vm538_vm0 = vmmov 0   ;;  %v539_v4 = vmov 0.0   ;;  %s665_s0 = inlined_call_operand.vmem [shape: f32[8,16], index: 0, kind: input, shape index: {}]   ;;  %s666_s1 = inlined_call_operand.vmem [shape: f32[16,32], index: 1, kind: input, shape index: {}]   ;;  %s667_s2 = inlined_call_operand.vmem [shape: f32[1,32], index: 2, kind: input, shape index: {}]   ;;  %s668_s3 = inlined_call_operand.vmem [shape: f32[32,72], index: 3, kind: input, shape index: {}]   ;;  %s669_s4 = inlined_call_operand.vmem [shape: f32[16,72], index: 4, kind: input, shape index: {}]   ;;  %s670_s5 = inlined_call_operand.vmem [shape: f32[1,72], index: 5, kind: input, shape index: {}]   ;;  %s671_s6 = inlined_call_operand.vmem [shape: f32[72,6], index: 6, kind: input, shape index: {}]   ;;  %s672_s7 = inlined_call_operand.vmem [shape: f32[1,6], index: 7, kind: input, shape index: {}]   ;;  %s673_s8 = inlined_call_operand.hbm [shape: f32[8,6], index: 8, kind: output, shape index: {}]  }
   0x1   :  { %v31_v0 = vld [vmem:[%s666_s1] sm:$0xff]  ;;  %v32_v1 = vld [vmem:[%s666_s1 + $0x8] sm:$0xff]  ;;  %473 = vmatprep.subr.bf16.mxu0 %v537_v2  ;;  %431 = vmatprep.mubr.msk.f32.mxu0 %vm538_vm0, %v539_v4 }
   0x2   :  { %v474_v3 = vpack.c.bf16 %v32_v1, %v31_v0 }
   0x3   :  { %13 = vsyncpa [#allocation3], 0  ;;  %485 = vmatprep.subr.bf16.mxu1 %v537_v2  ;;  %470 = vmatprep.mubr.msk.f32.mxu1 %vm538_vm0, %v539_v4  ;;  %v30_v5 = vld [vmem:[%s665_s0] sm:$0xff]  ;;  %vm40_vm1 = vcmask 130048   ;;  %v125_v7 = vld [vmem:[%s669_s4 + $0x8] sm:$0xff]  ;;  %vm196_vm2 = vcmask 261120  }
   0x4   :  { %475 = vmatpush3.bf16.msra.mxu0 %v474_v3  ;;  %v124_v6 = vld [vmem:[%s669_s4] sm:$0xff]  ;;  %v121_v10 = vld [vmem:[%s668_s3 + $0x8] sm:$0xff]  ;;  %v122_v12 = vld [vmem:[%s668_s3 + $0x10] sm:$0xff]  ;;  %vm300_vm3 = vcmask 588800   ;;  %vm380_vm4 = vcmask 48128  }
   0x5   :  { %476 = vmatprep.subr.bf16.mxu0 %v537_v2  ;;  %v477_v8 = vpack.c.bf16 %v125_v7, %v124_v6  ;;  %v120_v9 = vld [vmem:[%s668_s3] sm:$0xff]  ;;  %v123_v13 = vld [vmem:[%s668_s3 + $0x18] sm:$0xff]  ;;  %v285_v26 = vld [vmem:[%s671_s6 + $0x8] sm:$0xff] }
   0x6   :  { %v480_v11 = vpack.c.bf16 %v121_v10, %v120_v9  ;;  %v483_v14 = vpack.c.bf16 %v123_v13, %v122_v12  ;;  %v396_v15 = vld [vmem:[%s667_s2] ss:$0 sm:$0xff]  ;;  %v286_v28 = vld [vmem:[%s671_s6 + $0x10] sm:$0xff]  ;;  %v287_v29 = vld [vmem:[%s671_s6 + $0x18] sm:$0xff] }
   0x7   :  { %432 = vmatmul.mubr.msk.f32.vlgmr.msra.gmra.mrb[0].mxu0 %vm40_vm1, %v30_v5  ;;  %v284_v25 = vld [vmem:[%s671_s6] sm:$0xff]  ;;  %v489_v30 = vpack.c.bf16 %v287_v29, %v286_v28  ;;  %v289_v32 = vld [vmem:[%s671_s6 + $0x28] sm:$0xff]  ;;  %v290_v34 = vld [vmem:[%s671_s6 + $0x30] sm:$0xff] }
   0x8   :  { %438 = vmatprep.mubr.msk.f32.mxu0 %vm538_vm0, %v539_v4  ;;  %478 = vmatpush3.bf16.msra.mxu0 %v477_v8  ;;  %v486_v27 = vpack.c.bf16 %v285_v26, %v284_v25  ;;  %v288_v31 = vld [vmem:[%s671_s6 + $0x20] sm:$0xff]  ;;  %v291_v35 = vld [vmem:[%s671_s6 + $0x38] sm:$0xff] }
   0x9   :  { %479 = vmatprep.subr.bf16.mxu0 %v537_v2  ;;  %v492_v33 = vpack.c.bf16 %v289_v32, %v288_v31  ;;  %v495_v36 = vpack.c.bf16 %v291_v35, %v290_v34  ;;  %v292_v37 = vld [vmem:[%s671_s6 + $0x40] sm:$0xff] }
   0xa   :  { %487 = vmatpush3.bf16.msra.mxu1 %v486_v27  ;;  %v401_v39 = vld [vmem:[%s670_s5] ss:$0 sm:$0xff]  ;;  %s540_s5 = smov [#allocation2]  }
   0xb   :  { %439 = vmatmul.mubr.msk.f32.vlgmr.msra.gmra.mrb[2].mxu0 %vm40_vm1, %v30_v5  ;;  %488 = vmatprep.subr.bf16.mxu1 %v537_v2  ;;  %v403_v47 = vld [vmem:[%s672_s7] ss:$0 sm:$0xff]  ;;  %s388_s6 = sshll.u32 %s540_s5, 4  ;;  %s389_s6 = int_to_ptr.vmem [resolvable:$true] %s388_s6 }
   0xc   :  { %481 = vmatpush3.bf16.msra.mxu0 %v480_v11  ;;  %449 = vmatprep.mubr.msk.f32.mxu0 %vm538_vm0, %v539_v4  ;;  %s513_s18 = scalar_lea.vmem %s389_s6, 128  ;;  %p518_p1 = scmp.lt.s32.totalorder %s389_s6, %s389_s6 }
   0xd   :  { %482 = vmatprep.subr.bf16.mxu0 %v537_v2  ;;  %p514_p0 = scmp.ne.s32.totalorder %s389_s6, %s513_s18  ;;  %p519_p2 = scmp.lt.s32.totalorder %s513_s18, %s513_s18 }
   0xe   :  { %490 = vmatpush3.bf16.msra.mxu1 %v489_v30 }
   0xf   :  { %491 = vmatprep.subr.bf16.mxu1 %v537_v2  ;;  %p520_p3 = por %p519_p2, %p518_p1 }
  0x10   :  { %484 = vmatpush3.bf16.msra.mxu0 %v483_v14 }
  0x11   :  { %p521_p4 = pnand %p520_p3, %p514_p0 }
  0x12   :  { %493 = vmatpush3.bf16.msra.mxu1 %v492_v33 }
  0x13   :  { %494 = vmatprep.subr.bf16.mxu1 %v537_v2 }
  0x16   :  { %496 = vmatpush3.bf16.msra.mxu1 %v495_v36 }
  0x17   :  { %468 = vmatprep.subr.mxu1 %v539_v4 }
  0x1a   :  { %469 = vmatpush3.msra.mxu1 %v292_v37 }
  0xda   :  { %v110_v16 = vpop.f32.mrb[0].mxu0 }
  0xdb   :  { %v111_v17 = vadd.f32 %v396_v15, %v110_v16  ;;  %v433_v18 = vpop.f32.mrb[1].mxu0 }
  0xdd   :  { %v398_v19 = vmul.f32 -1.442695, %v111_v17 }
  0xde   :  { %v192_v23 = vpop.f32.mrb[2].mxu0 }
  0xdf   :  { %501 = vpow2.f32 %v398_v19  ;;  %v440_v24 = vpop.f32.mrb[3].mxu0 }
  0xe9   :  { %v502_v20 = vpop.eup %501 }
  0xea   :  { %v117_v21 = vadd.f32 1.0, %v502_v20 }
  0xec   :  { %503 = vrcp.f32 %v117_v21 }
  0xf6   :  { %v504_v22 = vpop.eup %503 }
  0xf7   :  { %450 = vmatmul.mubr.msk.f32.vlgmr.msra.gmra.mrb[4].mxu0 %vm196_vm2, %v504_v22 }
 0x1ca   :  { %v266_v38 = vpop.f32.mrb[4].mxu0 }
 0x1cb   :  { %v267_v40 = vadd.f32 %v266_v38, %v192_v23  ;;  %v451_v41 = vpop.f32.mrb[5].mxu0 }
 0x1cd   :  { %v277_v42 = vadd.f32 %v401_v39, %v267_v40 }
 0x1cf   :  { %v402_v43 = vmul.f32 -1.442695, %v277_v42 }
 0x1d1   :  { %505 = vpow2.f32 %v402_v43 }
 0x1db   :  { %v506_v44 = vpop.eup %505 }
 0x1dc   :  { %v281_v45 = vadd.f32 1.0, %v506_v44 }
 0x1de   :  { %507 = vrcp.f32 %v281_v45 }
 0x1e8   :  { %v508_v46 = vpop.eup %507 }
 0x1e9   :  { %471 = vmatmul.mubr.msk.f32.vlgmr.msra.gmra.mrb[0].mxu1 %vm300_vm3, %v508_v46 }
 0x2bc   :  { %v370_v48 = vpop.f32.mrb[0].mxu1 }
 0x2bd   :  { %v371_v49 = vadd.f32 %v403_v47, %v370_v48  ;;  %v472_v50 = vpop.f32.mrb[1].mxu1 }
 0x2bf   :  { %v405_v51 = vmul.f32 -1.442695, %v371_v49 }
 0x2c1   :  { %509 = vpow2.f32 %v405_v51 }
 0x2cb   :  { %v510_v52 = vpop.eup %509 }
 0x2cc   :  { %v377_v53 = vadd.f32 1.0, %v510_v52 }
 0x2ce   :  { %511 = vrcp.f32 %v377_v53 }
 0x2d8   :  { %v512_v54 = vpop.eup %511 }
 0x2d9   :  { %381 = vst.msk [vmem:[#allocation2] sm:$0xff] %vm380_vm4, %v512_v54 }
 0x2da   :  { %524 = shalt.err (!%p521_p4)
}
 0x2db   :  { %s525_s20 = scalar_lea.hbm %s673_s8, 128 }
 0x2dc   :  { %p526_p5 = scmp.ne.s32.totalorder %s673_s8, %s525_s20  ;;  %p529_p6 = scmp.lt.u32.totalorder %s525_s20, %s673_s8 }
 0x2de   :  { %p531_p7 = pnand %p529_p6, %p526_p5 }
 0x2e0   :  { %534 = shalt.err (!%p531_p7)
}
 0x2e1   :  { %391 = dma.vmem_to_hbm [thread:$0]  %s389_s6, 128, %s673_s8, [#allocation3]  }
 0x2e2   :  { %535 = dma.done.wait [#allocation3], 128  }
 0x2e3   :  { %536 = vsyncadd [#allocation3], 4294967168 }
 0x2e4   :  { %395 = vsyncpa [#allocation3], 1 }

</bundles_post_ra>
